<compile_context>
chip_gen: v6e
topology: v6e:2x2x1
jax: 0.10.0
libtpu: 0.0.40
codegen_flags: <defaults>
</compile_context>

<pallas_src>
import jax
import jax.numpy as jnp
from jax import lax
from jax.experimental import pallas as pl
from jax.experimental.pallas import tpu as pltpu

# ------------------------- model sizes (small, synthetic) -------------------
SEQ = 6            # number of observations
BATCH = 4
INPUT_SIZE = 8
HIDDEN = 32
OUTPUT_SIZE = 8
TIME_STEPS = 4     # Euler sub-steps between observations

# ---------------- packed-parameter slab layout (rows, 8-aligned weights) ----
_ROW_B_H = 0
_ROW_B_ODE = 1
_ROW_B_OUT = 2
_ROW_W_IH = 8                      # rows  8..15   (I=8  rows)
_ROW_W_HH = 16                     # rows 16..47   (H=32 rows)
_ROW_W_ODE = 48                    # rows 48..79
_ROW_W_OUT = 80                    # rows 80..111
_SLAB_ROWS = 112
_SLAB_LANES = 128


def _ode_rnn_kernel(dts_ref,       # SMEM (SEQ,)            f32
                    x_ref,         # VMEM (SEQ*B, I)        f32
                    p_ref,         # VMEM (112, 128)        f32  packed params
                    out_ref):      # VMEM (B, O)            f32
    # ---- static slices of the packed parameter slab (loaded into vregs) ----
    b_h = p_ref[_ROW_B_H:_ROW_B_H + 1, 0:HIDDEN]                      # (1, H)
    b_ode = p_ref[_ROW_B_ODE:_ROW_B_ODE + 1, 0:HIDDEN]                # (1, H)
    b_out = p_ref[_ROW_B_OUT:_ROW_B_OUT + 1, 0:OUTPUT_SIZE]           # (1, O)
    w_ih = p_ref[_ROW_W_IH:_ROW_W_IH + INPUT_SIZE, 0:HIDDEN]          # (I, H)
    w_hh = p_ref[_ROW_W_HH:_ROW_W_HH + HIDDEN, 0:HIDDEN]              # (H, H)
    w_ode = p_ref[_ROW_W_ODE:_ROW_W_ODE + HIDDEN, 0:HIDDEN]           # (H, H)
    w_out = p_ref[_ROW_W_OUT:_ROW_W_OUT + HIDDEN, 0:OUTPUT_SIZE]      # (H, O)

    # ---- prologue: fused single-dot input projection (off the recurrence) --
    # (SEQ*B, I) @ (I, H) + b_h  -> kept as a VALUE (~3 vregs), never spilled.
    xproj = (jnp.dot(x_ref[...], w_ih, preferred_element_type=jnp.float32)
             + b_h)                                                    # (S*B, H)

    # Hoisted broadcasts (JAX does not CSE broadcast_in_dim inside unrolls).
    b_ode_b = jnp.broadcast_to(b_ode, (BATCH, HIDDEN))
    tanh_b_ode_b = jnp.broadcast_to(jnp.tanh(b_ode), (BATCH, HIDDEN))
    inv_ts = jnp.float32(1.0 / TIME_STEPS)

    # ---- serial recurrence: h carried in vregs, fully unrolled -------------
    h = jnp.zeros((BATCH, HIDDEN), jnp.float32)
    for s in range(SEQ):                       # static Python loop (unrolled)
        step = dts_ref[s] * inv_ts             # scalar from SMEM
        step_b = jnp.broadcast_to(step, (BATCH, HIDDEN))   # splat once / obs

        if s == 0:
            # h == 0 here: first Euler sub-step is exactly step * tanh(b_ode);
            # skip its matmul (one fewer MXU->EUP link on the serial chain).
            h = step_b * tanh_b_ode_b
            n_sub = TIME_STEPS - 1
        else:
            n_sub = TIME_STEPS

        def euler_body(_, h_cur, step_b=step_b):
            f = jnp.tanh(
                jnp.dot(h_cur, w_ode, preferred_element_type=jnp.float32)
                + b_ode_b)
            return h_cur + step_b * f

        h = lax.fori_loop(0, n_sub, euler_body, h, unroll=True)

        # RNN cell update; x-projection slice is static (s is a Python int).
        x_p = xproj[s * BATCH:(s + 1) * BATCH, :]
        h = jnp.tanh(x_p + jnp.dot(h, w_hh,
                                   preferred_element_type=jnp.float32))

    # ---- final linear readout ----------------------------------------------
    out = jnp.dot(h, w_out, preferred_element_type=jnp.float32) + b_out
    out_ref[...] = out.astype(out_ref.dtype)


def pack_params(params):
    """Pack the 7 small parameter tensors into one lane-padded f32 slab.

    Done once at init (outside the hot path); replaces 8 tiny VMEM operands
    (each padded to >= one (8,128) tile + its own DMA descriptor) with one DMA.
    """
    slab = jnp.zeros((_SLAB_ROWS, _SLAB_LANES), jnp.float32)
    slab = slab.at[_ROW_B_H, :HIDDEN].set(params["b_h"][0])
    slab = slab.at[_ROW_B_ODE, :HIDDEN].set(params["b_ode"][0])
    slab = slab.at[_ROW_B_OUT, :OUTPUT_SIZE].set(params["b_out"][0])
    slab = slab.at[_ROW_W_IH:_ROW_W_IH + INPUT_SIZE, :HIDDEN].set(params["w_ih"])
    slab = slab.at[_ROW_W_HH:_ROW_W_HH + HIDDEN, :HIDDEN].set(params["w_hh"])
    slab = slab.at[_ROW_W_ODE:_ROW_W_ODE + HIDDEN, :HIDDEN].set(params["w_ode"])
    slab = slab.at[_ROW_W_OUT:_ROW_W_OUT + HIDDEN, :OUTPUT_SIZE].set(params["w_out"])
    return slab


def rnn_ode_forward(x, t, param_slab):
    """x: (SEQ, B, I) f32; t: (SEQ,) f32 observation times; param_slab: packed."""
    seq, b, i = x.shape

    # dt_i = t_i - t_{i-1}  (dt_0 = t_0, i.e. integrate from time 0)
    dts = jnp.concatenate([t[:1], t[1:] - t[:-1]]).astype(jnp.float32)

    # Pure layout plumbing: present x as one (SEQ*B, I) slab for a single
    # fused projection matmul inside the kernel.
    x_flat = x.reshape(seq * b, i)

    vmem = pl.BlockSpec(memory_space=pltpu.MemorySpace.VMEM)
    smem = pl.BlockSpec(memory_space=pltpu.MemorySpace.SMEM)

    return pl.pallas_call(
        _ode_rnn_kernel,
        out_shape=jax.ShapeDtypeStruct((b, OUTPUT_SIZE), jnp.float32),
        in_specs=[smem, vmem, vmem],
        out_specs=vmem,
    )(dts, x_flat, param_slab)


def rnn_ode_reference(x, t, params):
    """Pure-JAX reference of the same forward pass."""
    dts = jnp.concatenate([t[:1], t[1:] - t[:-1]])
    h = jnp.zeros((x.shape[1], params["w_hh"].shape[0]), jnp.float32)
    for s in range(x.shape[0]):
        step = dts[s] / TIME_STEPS
        for _ in range(TIME_STEPS):
            h = h + step * jnp.tanh(h @ params["w_ode"] + params["b_ode"])
        h = jnp.tanh(x[s] @ params["w_ih"] + h @ params["w_hh"] + params["b_h"])
    return h @ params["w_out"] + params["b_out"]


def init_params(key):
    ks = jax.random.split(key, 7)
    scale = 0.3
    return {
        "w_ih":  scale * jax.random.normal(ks[0], (INPUT_SIZE, HIDDEN), jnp.float32),
        "w_hh":  scale * jax.random.normal(ks[1], (HIDDEN, HIDDEN), jnp.float32),
        "b_h":   scale * jax.random.normal(ks[2], (1, HIDDEN), jnp.float32),
        "w_ode": scale * jax.random.normal(ks[3], (HIDDEN, HIDDEN), jnp.float32),
        "b_ode": scale * jax.random.normal(ks[4], (1, HIDDEN), jnp.float32),
        "w_out": scale * jax.random.normal(ks[5], (HIDDEN, OUTPUT_SIZE), jnp.float32),
        "b_out": scale * jax.random.normal(ks[6], (1, OUTPUT_SIZE), jnp.float32),
    }


if __name__ == "__main__":
    key = jax.random.PRNGKey(0)
    k_x, k_p = jax.random.split(key)

    # data = (x, t): observation sequence and (monotonic) observation times.
    x = jax.random.normal(k_x, (SEQ, BATCH, INPUT_SIZE), jnp.float32)
    t = jnp.cumsum(jnp.full((SEQ,), 0.1, jnp.float32))

    params = init_params(k_p)
    param_slab = pack_params(params)       # one-time packing, outside hot path

    out = rnn_ode_forward(x, t, param_slab)
    out = jax.block_until_ready(out)

    ref = rnn_ode_reference(x, t, params)
    assert out.shape == (BATCH, OUTPUT_SIZE)
    assert jnp.allclose(out, ref, rtol=2e-3, atol=2e-3), (out, ref)

    print("KERNEL_OK")
</pallas_src>

<mosaic_0001>
module attributes {stable_mosaic.version = 11 : i64} {
  func.func @_ode_rnn_kernel(%arg0: memref<6xf32, #tpu.memory_space<smem>>, %arg1: memref<24x8xf32, #tpu.memory_space<vmem>>, %arg2: memref<112x128xf32, #tpu.memory_space<vmem>>, %arg3: memref<4x8xf32, #tpu.memory_space<vmem>>) attributes {dimension_semantics = [], scalar_prefetch = 0 : i64, scratch_operands = 0 : i64, tpu.core_type = #tpu.core_type<tc>} {
    %c0 = arith.constant 0 : index
    %c0_0 = arith.constant 0 : index
    %0 = vector.load %arg2[%c0, %c0_0] : memref<112x128xf32, #tpu.memory_space<vmem>>, vector<1x32xf32>
    %c1 = arith.constant 1 : index
    %c0_1 = arith.constant 0 : index
    %1 = vector.load %arg2[%c1, %c0_1] : memref<112x128xf32, #tpu.memory_space<vmem>>, vector<1x32xf32>
    %c2 = arith.constant 2 : index
    %c0_2 = arith.constant 0 : index
    %2 = vector.load %arg2[%c2, %c0_2] : memref<112x128xf32, #tpu.memory_space<vmem>>, vector<1x8xf32>
    %c8 = arith.constant 8 : index
    %c0_3 = arith.constant 0 : index
    %3 = vector.load %arg2[%c8, %c0_3] : memref<112x128xf32, #tpu.memory_space<vmem>>, vector<8x32xf32>
    %c16 = arith.constant 16 : index
    %c0_4 = arith.constant 0 : index
    %4 = vector.load %arg2[%c16, %c0_4] : memref<112x128xf32, #tpu.memory_space<vmem>>, vector<32x32xf32>
    %c48 = arith.constant 48 : index
    %c0_5 = arith.constant 0 : index
    %5 = vector.load %arg2[%c48, %c0_5] : memref<112x128xf32, #tpu.memory_space<vmem>>, vector<32x32xf32>
    %c80 = arith.constant 80 : index
    %c0_6 = arith.constant 0 : index
    %6 = vector.load %arg2[%c80, %c0_6] : memref<112x128xf32, #tpu.memory_space<vmem>>, vector<32x8xf32>
    %c0_7 = arith.constant 0 : index
    %c0_8 = arith.constant 0 : index
    %7 = vector.load %arg1[%c0_7, %c0_8] : memref<24x8xf32, #tpu.memory_space<vmem>>, vector<24x8xf32>
    %cst = arith.constant dense<0.000000e+00> : vector<24x32xf32>
    %8 = tpu.matmul %7, %3, %cst {dimension_numbers = #tpu.dot_dimension_numbers<[1], [0], [0], [1], [0, 0, 1, 1], [], []>} : vector<24x8xf32>, vector<8x32xf32>, vector<24x32xf32> -> vector<24x32xf32>
    %9 = vector.broadcast %0 : vector<1x32xf32> to vector<24x32xf32>
    %10 = arith.addf %8, %9 : vector<24x32xf32>
    %11 = vector.shape_cast %1 : vector<1x32xf32> to vector<1x32xf32>
    %12 = vector.broadcast %11 : vector<1x32xf32> to vector<4x32xf32>
    %13 = math.tanh %1 : vector<1x32xf32>
    %14 = vector.shape_cast %13 : vector<1x32xf32> to vector<1x32xf32>
    %15 = vector.broadcast %14 : vector<1x32xf32> to vector<4x32xf32>
    %c0_9 = arith.constant 0 : index
    %16 = memref.load %arg0[%c0_9] : memref<6xf32, #tpu.memory_space<smem>>
    %cst_10 = arith.constant 2.500000e-01 : f32
    %17 = arith.mulf %16, %cst_10 : f32
    %18 = vector.broadcast %17 : f32 to vector<4x32xf32>
    %19 = arith.mulf %18, %15 : vector<4x32xf32>
    %c0_i32 = arith.constant 0 : i32
    %cst_11 = arith.constant dense<0.000000e+00> : vector<4x32xf32>
    %20 = tpu.matmul %19, %5, %cst_11 {dimension_numbers = #tpu.dot_dimension_numbers<[1], [0], [0], [1], [0, 0, 1, 1], [], []>} : vector<4x32xf32>, vector<32x32xf32>, vector<4x32xf32> -> vector<4x32xf32>
    %21 = arith.addf %20, %12 : vector<4x32xf32>
    %22 = math.tanh %21 : vector<4x32xf32>
    %23 = arith.mulf %18, %22 : vector<4x32xf32>
    %24 = arith.addf %19, %23 : vector<4x32xf32>
    %c1_i32 = arith.constant 1 : i32
    %cst_12 = arith.constant dense<0.000000e+00> : vector<4x32xf32>
    %25 = tpu.matmul %24, %5, %cst_12 {dimension_numbers = #tpu.dot_dimension_numbers<[1], [0], [0], [1], [0, 0, 1, 1], [], []>} : vector<4x32xf32>, vector<32x32xf32>, vector<4x32xf32> -> vector<4x32xf32>
    %26 = arith.addf %25, %12 : vector<4x32xf32>
    %27 = math.tanh %26 : vector<4x32xf32>
    %28 = arith.mulf %18, %27 : vector<4x32xf32>
    %29 = arith.addf %24, %28 : vector<4x32xf32>
    %c2_i32 = arith.constant 2 : i32
    %cst_13 = arith.constant dense<0.000000e+00> : vector<4x32xf32>
    %30 = tpu.matmul %29, %5, %cst_13 {dimension_numbers = #tpu.dot_dimension_numbers<[1], [0], [0], [1], [0, 0, 1, 1], [], []>} : vector<4x32xf32>, vector<32x32xf32>, vector<4x32xf32> -> vector<4x32xf32>
    %31 = arith.addf %30, %12 : vector<4x32xf32>
    %32 = math.tanh %31 : vector<4x32xf32>
    %33 = arith.mulf %18, %32 : vector<4x32xf32>
    %34 = arith.addf %29, %33 : vector<4x32xf32>
    %35 = vector.extract_strided_slice %10 {offsets = [0, 0], sizes = [4, 32], strides = [1, 1]} : vector<24x32xf32> to vector<4x32xf32>
    %cst_14 = arith.constant dense<0.000000e+00> : vector<4x32xf32>
    %36 = tpu.matmul %34, %4, %cst_14 {dimension_numbers = #tpu.dot_dimension_numbers<[1], [0], [0], [1], [0, 0, 1, 1], [], []>} : vector<4x32xf32>, vector<32x32xf32>, vector<4x32xf32> -> vector<4x32xf32>
    %37 = arith.addf %35, %36 : vector<4x32xf32>
    %38 = math.tanh %37 : vector<4x32xf32>
    %c1_15 = arith.constant 1 : index
    %39 = memref.load %arg0[%c1_15] : memref<6xf32, #tpu.memory_space<smem>>
    %cst_16 = arith.constant 2.500000e-01 : f32
    %40 = arith.mulf %39, %cst_16 : f32
    %41 = vector.broadcast %40 : f32 to vector<4x32xf32>
    %c0_i32_17 = arith.constant 0 : i32
    %cst_18 = arith.constant dense<0.000000e+00> : vector<4x32xf32>
    %42 = tpu.matmul %38, %5, %cst_18 {dimension_numbers = #tpu.dot_dimension_numbers<[1], [0], [0], [1], [0, 0, 1, 1], [], []>} : vector<4x32xf32>, vector<32x32xf32>, vector<4x32xf32> -> vector<4x32xf32>
    %43 = arith.addf %42, %12 : vector<4x32xf32>
    %44 = math.tanh %43 : vector<4x32xf32>
    %45 = arith.mulf %41, %44 : vector<4x32xf32>
    %46 = arith.addf %38, %45 : vector<4x32xf32>
    %c1_i32_19 = arith.constant 1 : i32
    %cst_20 = arith.constant dense<0.000000e+00> : vector<4x32xf32>
    %47 = tpu.matmul %46, %5, %cst_20 {dimension_numbers = #tpu.dot_dimension_numbers<[1], [0], [0], [1], [0, 0, 1, 1], [], []>} : vector<4x32xf32>, vector<32x32xf32>, vector<4x32xf32> -> vector<4x32xf32>
    %48 = arith.addf %47, %12 : vector<4x32xf32>
    %49 = math.tanh %48 : vector<4x32xf32>
    %50 = arith.mulf %41, %49 : vector<4x32xf32>
    %51 = arith.addf %46, %50 : vector<4x32xf32>
    %c2_i32_21 = arith.constant 2 : i32
    %cst_22 = arith.constant dense<0.000000e+00> : vector<4x32xf32>
    %52 = tpu.matmul %51, %5, %cst_22 {dimension_numbers = #tpu.dot_dimension_numbers<[1], [0], [0], [1], [0, 0, 1, 1], [], []>} : vector<4x32xf32>, vector<32x32xf32>, vector<4x32xf32> -> vector<4x32xf32>
    %53 = arith.addf %52, %12 : vector<4x32xf32>
    %54 = math.tanh %53 : vector<4x32xf32>
    %55 = arith.mulf %41, %54 : vector<4x32xf32>
    %56 = arith.addf %51, %55 : vector<4x32xf32>
    %c3_i32 = arith.constant 3 : i32
    %cst_23 = arith.constant dense<0.000000e+00> : vector<4x32xf32>
    %57 = tpu.matmul %56, %5, %cst_23 {dimension_numbers = #tpu.dot_dimension_numbers<[1], [0], [0], [1], [0, 0, 1, 1], [], []>} : vector<4x32xf32>, vector<32x32xf32>, vector<4x32xf32> -> vector<4x32xf32>
    %58 = arith.addf %57, %12 : vector<4x32xf32>
    %59 = math.tanh %58 : vector<4x32xf32>
    %60 = arith.mulf %41, %59 : vector<4x32xf32>
    %61 = arith.addf %56, %60 : vector<4x32xf32>
    %62 = vector.extract_strided_slice %10 {offsets = [4, 0], sizes = [4, 32], strides = [1, 1]} : vector<24x32xf32> to vector<4x32xf32>
    %cst_24 = arith.constant dense<0.000000e+00> : vector<4x32xf32>
    %63 = tpu.matmul %61, %4, %cst_24 {dimension_numbers = #tpu.dot_dimension_numbers<[1], [0], [0], [1], [0, 0, 1, 1], [], []>} : vector<4x32xf32>, vector<32x32xf32>, vector<4x32xf32> -> vector<4x32xf32>
    %64 = arith.addf %62, %63 : vector<4x32xf32>
    %65 = math.tanh %64 : vector<4x32xf32>
    %c2_25 = arith.constant 2 : index
    %66 = memref.load %arg0[%c2_25] : memref<6xf32, #tpu.memory_space<smem>>
    %cst_26 = arith.constant 2.500000e-01 : f32
    %67 = arith.mulf %66, %cst_26 : f32
    %68 = vector.broadcast %67 : f32 to vector<4x32xf32>
    %c0_i32_27 = arith.constant 0 : i32
    %cst_28 = arith.constant dense<0.000000e+00> : vector<4x32xf32>
    %69 = tpu.matmul %65, %5, %cst_28 {dimension_numbers = #tpu.dot_dimension_numbers<[1], [0], [0], [1], [0, 0, 1, 1], [], []>} : vector<4x32xf32>, vector<32x32xf32>, vector<4x32xf32> -> vector<4x32xf32>
    %70 = arith.addf %69, %12 : vector<4x32xf32>
    %71 = math.tanh %70 : vector<4x32xf32>
    %72 = arith.mulf %68, %71 : vector<4x32xf32>
    %73 = arith.addf %65, %72 : vector<4x32xf32>
    %c1_i32_29 = arith.constant 1 : i32
    %cst_30 = arith.constant dense<0.000000e+00> : vector<4x32xf32>
    %74 = tpu.matmul %73, %5, %cst_30 {dimension_numbers = #tpu.dot_dimension_numbers<[1], [0], [0], [1], [0, 0, 1, 1], [], []>} : vector<4x32xf32>, vector<32x32xf32>, vector<4x32xf32> -> vector<4x32xf32>
    %75 = arith.addf %74, %12 : vector<4x32xf32>
    %76 = math.tanh %75 : vector<4x32xf32>
    %77 = arith.mulf %68, %76 : vector<4x32xf32>
    %78 = arith.addf %73, %77 : vector<4x32xf32>
    %c2_i32_31 = arith.constant 2 : i32
    %cst_32 = arith.constant dense<0.000000e+00> : vector<4x32xf32>
    %79 = tpu.matmul %78, %5, %cst_32 {dimension_numbers = #tpu.dot_dimension_numbers<[1], [0], [0], [1], [0, 0, 1, 1], [], []>} : vector<4x32xf32>, vector<32x32xf32>, vector<4x32xf32> -> vector<4x32xf32>
    %80 = arith.addf %79, %12 : vector<4x32xf32>
    %81 = math.tanh %80 : vector<4x32xf32>
    %82 = arith.mulf %68, %81 : vector<4x32xf32>
    %83 = arith.addf %78, %82 : vector<4x32xf32>
    %c3_i32_33 = arith.constant 3 : i32
    %cst_34 = arith.constant dense<0.000000e+00> : vector<4x32xf32>
    %84 = tpu.matmul %83, %5, %cst_34 {dimension_numbers = #tpu.dot_dimension_numbers<[1], [0], [0], [1], [0, 0, 1, 1], [], []>} : vector<4x32xf32>, vector<32x32xf32>, vector<4x32xf32> -> vector<4x32xf32>
    %85 = arith.addf %84, %12 : vector<4x32xf32>
    %86 = math.tanh %85 : vector<4x32xf32>
    %87 = arith.mulf %68, %86 : vector<4x32xf32>
    %88 = arith.addf %83, %87 : vector<4x32xf32>
    %89 = vector.extract_strided_slice %10 {offsets = [8, 0], sizes = [4, 32], strides = [1, 1]} : vector<24x32xf32> to vector<4x32xf32>
    %cst_35 = arith.constant dense<0.000000e+00> : vector<4x32xf32>
    %90 = tpu.matmul %88, %4, %cst_35 {dimension_numbers = #tpu.dot_dimension_numbers<[1], [0], [0], [1], [0, 0, 1, 1], [], []>} : vector<4x32xf32>, vector<32x32xf32>, vector<4x32xf32> -> vector<4x32xf32>
    %91 = arith.addf %89, %90 : vector<4x32xf32>
    %92 = math.tanh %91 : vector<4x32xf32>
    %c3 = arith.constant 3 : index
    %93 = memref.load %arg0[%c3] : memref<6xf32, #tpu.memory_space<smem>>
    %cst_36 = arith.constant 2.500000e-01 : f32
    %94 = arith.mulf %93, %cst_36 : f32
    %95 = vector.broadcast %94 : f32 to vector<4x32xf32>
    %c0_i32_37 = arith.constant 0 : i32
    %cst_38 = arith.constant dense<0.000000e+00> : vector<4x32xf32>
    %96 = tpu.matmul %92, %5, %cst_38 {dimension_numbers = #tpu.dot_dimension_numbers<[1], [0], [0], [1], [0, 0, 1, 1], [], []>} : vector<4x32xf32>, vector<32x32xf32>, vector<4x32xf32> -> vector<4x32xf32>
    %97 = arith.addf %96, %12 : vector<4x32xf32>
    %98 = math.tanh %97 : vector<4x32xf32>
    %99 = arith.mulf %95, %98 : vector<4x32xf32>
    %100 = arith.addf %92, %99 : vector<4x32xf32>
    %c1_i32_39 = arith.constant 1 : i32
    %cst_40 = arith.constant dense<0.000000e+00> : vector<4x32xf32>
    %101 = tpu.matmul %100, %5, %cst_40 {dimension_numbers = #tpu.dot_dimension_numbers<[1], [0], [0], [1], [0, 0, 1, 1], [], []>} : vector<4x32xf32>, vector<32x32xf32>, vector<4x32xf32> -> vector<4x32xf32>
    %102 = arith.addf %101, %12 : vector<4x32xf32>
    %103 = math.tanh %102 : vector<4x32xf32>
    %104 = arith.mulf %95, %103 : vector<4x32xf32>
    %105 = arith.addf %100, %104 : vector<4x32xf32>
    %c2_i32_41 = arith.constant 2 : i32
    %cst_42 = arith.constant dense<0.000000e+00> : vector<4x32xf32>
    %106 = tpu.matmul %105, %5, %cst_42 {dimension_numbers = #tpu.dot_dimension_numbers<[1], [0], [0], [1], [0, 0, 1, 1], [], []>} : vector<4x32xf32>, vector<32x32xf32>, vector<4x32xf32> -> vector<4x32xf32>
    %107 = arith.addf %106, %12 : vector<4x32xf32>
    %108 = math.tanh %107 : vector<4x32xf32>
    %109 = arith.mulf %95, %108 : vector<4x32xf32>
    %110 = arith.addf %105, %109 : vector<4x32xf32>
    %c3_i32_43 = arith.constant 3 : i32
    %cst_44 = arith.constant dense<0.000000e+00> : vector<4x32xf32>
    %111 = tpu.matmul %110, %5, %cst_44 {dimension_numbers = #tpu.dot_dimension_numbers<[1], [0], [0], [1], [0, 0, 1, 1], [], []>} : vector<4x32xf32>, vector<32x32xf32>, vector<4x32xf32> -> vector<4x32xf32>
    %112 = arith.addf %111, %12 : vector<4x32xf32>
    %113 = math.tanh %112 : vector<4x32xf32>
    %114 = arith.mulf %95, %113 : vector<4x32xf32>
    %115 = arith.addf %110, %114 : vector<4x32xf32>
    %116 = vector.extract_strided_slice %10 {offsets = [12, 0], sizes = [4, 32], strides = [1, 1]} : vector<24x32xf32> to vector<4x32xf32>
    %cst_45 = arith.constant dense<0.000000e+00> : vector<4x32xf32>
    %117 = tpu.matmul %115, %4, %cst_45 {dimension_numbers = #tpu.dot_dimension_numbers<[1], [0], [0], [1], [0, 0, 1, 1], [], []>} : vector<4x32xf32>, vector<32x32xf32>, vector<4x32xf32> -> vector<4x32xf32>
    %118 = arith.addf %116, %117 : vector<4x32xf32>
    %119 = math.tanh %118 : vector<4x32xf32>
    %c4 = arith.constant 4 : index
    %120 = memref.load %arg0[%c4] : memref<6xf32, #tpu.memory_space<smem>>
    %cst_46 = arith.constant 2.500000e-01 : f32
    %121 = arith.mulf %120, %cst_46 : f32
    %122 = vector.broadcast %121 : f32 to vector<4x32xf32>
    %c0_i32_47 = arith.constant 0 : i32
    %cst_48 = arith.constant dense<0.000000e+00> : vector<4x32xf32>
    %123 = tpu.matmul %119, %5, %cst_48 {dimension_numbers = #tpu.dot_dimension_numbers<[1], [0], [0], [1], [0, 0, 1, 1], [], []>} : vector<4x32xf32>, vector<32x32xf32>, vector<4x32xf32> -> vector<4x32xf32>
    %124 = arith.addf %123, %12 : vector<4x32xf32>
    %125 = math.tanh %124 : vector<4x32xf32>
    %126 = arith.mulf %122, %125 : vector<4x32xf32>
    %127 = arith.addf %119, %126 : vector<4x32xf32>
    %c1_i32_49 = arith.constant 1 : i32
    %cst_50 = arith.constant dense<0.000000e+00> : vector<4x32xf32>
    %128 = tpu.matmul %127, %5, %cst_50 {dimension_numbers = #tpu.dot_dimension_numbers<[1], [0], [0], [1], [0, 0, 1, 1], [], []>} : vector<4x32xf32>, vector<32x32xf32>, vector<4x32xf32> -> vector<4x32xf32>
    %129 = arith.addf %128, %12 : vector<4x32xf32>
    %130 = math.tanh %129 : vector<4x32xf32>
    %131 = arith.mulf %122, %130 : vector<4x32xf32>
    %132 = arith.addf %127, %131 : vector<4x32xf32>
    %c2_i32_51 = arith.constant 2 : i32
    %cst_52 = arith.constant dense<0.000000e+00> : vector<4x32xf32>
    %133 = tpu.matmul %132, %5, %cst_52 {dimension_numbers = #tpu.dot_dimension_numbers<[1], [0], [0], [1], [0, 0, 1, 1], [], []>} : vector<4x32xf32>, vector<32x32xf32>, vector<4x32xf32> -> vector<4x32xf32>
    %134 = arith.addf %133, %12 : vector<4x32xf32>
    %135 = math.tanh %134 : vector<4x32xf32>
    %136 = arith.mulf %122, %135 : vector<4x32xf32>
    %137 = arith.addf %132, %136 : vector<4x32xf32>
    %c3_i32_53 = arith.constant 3 : i32
    %cst_54 = arith.constant dense<0.000000e+00> : vector<4x32xf32>
    %138 = tpu.matmul %137, %5, %cst_54 {dimension_numbers = #tpu.dot_dimension_numbers<[1], [0], [0], [1], [0, 0, 1, 1], [], []>} : vector<4x32xf32>, vector<32x32xf32>, vector<4x32xf32> -> vector<4x32xf32>
    %139 = arith.addf %138, %12 : vector<4x32xf32>
    %140 = math.tanh %139 : vector<4x32xf32>
    %141 = arith.mulf %122, %140 : vector<4x32xf32>
    %142 = arith.addf %137, %141 : vector<4x32xf32>
    %143 = vector.extract_strided_slice %10 {offsets = [16, 0], sizes = [4, 32], strides = [1, 1]} : vector<24x32xf32> to vector<4x32xf32>
    %cst_55 = arith.constant dense<0.000000e+00> : vector<4x32xf32>
    %144 = tpu.matmul %142, %4, %cst_55 {dimension_numbers = #tpu.dot_dimension_numbers<[1], [0], [0], [1], [0, 0, 1, 1], [], []>} : vector<4x32xf32>, vector<32x32xf32>, vector<4x32xf32> -> vector<4x32xf32>
    %145 = arith.addf %143, %144 : vector<4x32xf32>
    %146 = math.tanh %145 : vector<4x32xf32>
    %c5 = arith.constant 5 : index
    %147 = memref.load %arg0[%c5] : memref<6xf32, #tpu.memory_space<smem>>
    %cst_56 = arith.constant 2.500000e-01 : f32
    %148 = arith.mulf %147, %cst_56 : f32
    %149 = vector.broadcast %148 : f32 to vector<4x32xf32>
    %c0_i32_57 = arith.constant 0 : i32
    %cst_58 = arith.constant dense<0.000000e+00> : vector<4x32xf32>
    %150 = tpu.matmul %146, %5, %cst_58 {dimension_numbers = #tpu.dot_dimension_numbers<[1], [0], [0], [1], [0, 0, 1, 1], [], []>} : vector<4x32xf32>, vector<32x32xf32>, vector<4x32xf32> -> vector<4x32xf32>
    %151 = arith.addf %150, %12 : vector<4x32xf32>
    %152 = math.tanh %151 : vector<4x32xf32>
    %153 = arith.mulf %149, %152 : vector<4x32xf32>
    %154 = arith.addf %146, %153 : vector<4x32xf32>
    %c1_i32_59 = arith.constant 1 : i32
    %cst_60 = arith.constant dense<0.000000e+00> : vector<4x32xf32>
    %155 = tpu.matmul %154, %5, %cst_60 {dimension_numbers = #tpu.dot_dimension_numbers<[1], [0], [0], [1], [0, 0, 1, 1], [], []>} : vector<4x32xf32>, vector<32x32xf32>, vector<4x32xf32> -> vector<4x32xf32>
    %156 = arith.addf %155, %12 : vector<4x32xf32>
    %157 = math.tanh %156 : vector<4x32xf32>
    %158 = arith.mulf %149, %157 : vector<4x32xf32>
    %159 = arith.addf %154, %158 : vector<4x32xf32>
    %c2_i32_61 = arith.constant 2 : i32
    %cst_62 = arith.constant dense<0.000000e+00> : vector<4x32xf32>
    %160 = tpu.matmul %159, %5, %cst_62 {dimension_numbers = #tpu.dot_dimension_numbers<[1], [0], [0], [1], [0, 0, 1, 1], [], []>} : vector<4x32xf32>, vector<32x32xf32>, vector<4x32xf32> -> vector<4x32xf32>
    %161 = arith.addf %160, %12 : vector<4x32xf32>
    %162 = math.tanh %161 : vector<4x32xf32>
    %163 = arith.mulf %149, %162 : vector<4x32xf32>
    %164 = arith.addf %159, %163 : vector<4x32xf32>
    %c3_i32_63 = arith.constant 3 : i32
    %cst_64 = arith.constant dense<0.000000e+00> : vector<4x32xf32>
    %165 = tpu.matmul %164, %5, %cst_64 {dimension_numbers = #tpu.dot_dimension_numbers<[1], [0], [0], [1], [0, 0, 1, 1], [], []>} : vector<4x32xf32>, vector<32x32xf32>, vector<4x32xf32> -> vector<4x32xf32>
    %166 = arith.addf %165, %12 : vector<4x32xf32>
    %167 = math.tanh %166 : vector<4x32xf32>
    %168 = arith.mulf %149, %167 : vector<4x32xf32>
    %169 = arith.addf %164, %168 : vector<4x32xf32>
    %170 = vector.extract_strided_slice %10 {offsets = [20, 0], sizes = [4, 32], strides = [1, 1]} : vector<24x32xf32> to vector<4x32xf32>
    %cst_65 = arith.constant dense<0.000000e+00> : vector<4x32xf32>
    %171 = tpu.matmul %169, %4, %cst_65 {dimension_numbers = #tpu.dot_dimension_numbers<[1], [0], [0], [1], [0, 0, 1, 1], [], []>} : vector<4x32xf32>, vector<32x32xf32>, vector<4x32xf32> -> vector<4x32xf32>
    %172 = arith.addf %170, %171 : vector<4x32xf32>
    %173 = math.tanh %172 : vector<4x32xf32>
    %cst_66 = arith.constant dense<0.000000e+00> : vector<4x8xf32>
    %174 = tpu.matmul %173, %6, %cst_66 {dimension_numbers = #tpu.dot_dimension_numbers<[1], [0], [0], [1], [0, 0, 1, 1], [], []>} : vector<4x32xf32>, vector<32x8xf32>, vector<4x8xf32> -> vector<4x8xf32>
    %175 = vector.broadcast %2 : vector<1x8xf32> to vector<4x8xf32>
    %176 = arith.addf %174, %175 : vector<4x8xf32>
    %c0_67 = arith.constant 0 : index
    %c0_68 = arith.constant 0 : index
    %177 = vector.load %arg3[%c0_67, %c0_68] : memref<4x8xf32, #tpu.memory_space<vmem>>, vector<4x8xf32>
    tpu.vector_store %arg3[%c0_67, %c0_68], %176 {strides = array<i32>} : memref<4x8xf32, #tpu.memory_space<vmem>>, vector<4x8xf32>,
    return
  }
}

</mosaic_0001>

<bundles_post_ra>
// kernel: tpu_custom_call.1
= control target key start
LH: loop header
LB: loop body
LE: loop exit
PB: predicated region body
PF: predicated region fallthrough
CT: control target
= control target key end

     0   :  { %8 = vsyncpa [#allocation5], 0  ;;  %s3635_s0 = inlined_call_operand.vmem [shape: f32[6], index: 0, kind: input, shape index: {}]   ;;  %s3636_s1 = inlined_call_operand.vmem [shape: f32[24,8], index: 1, kind: input, shape index: {}]   ;;  %s3637_s2 = inlined_call_operand.hbm [shape: f32[112,128], index: 2, kind: input, shape index: {}]   ;;  %s3638_s3 = inlined_call_operand.hbm [shape: f32[4,8], index: 3, kind: output, shape index: {}]  }
   0x1   :  { %9 = vsyncpa [#allocation3], 0 }
   0x2   :  { %10 = vsyncpa [#allocation4], 0  ;;  %s17_s14 = sshll.u32 %s3635_s0, 4  ;;  %s18_s14 = int_to_ptr.vmem [resolvable:$true] %s17_s14 }
   0x3   :  { %s3125_s15 = scalar_lea.vmem %s18_s14, 16  ;;  %p3130_p1 = scmp.lt.s32.totalorder %s18_s14, %s18_s14 }
   0x4   :  { %p3126_p0 = scmp.ne.s32.totalorder %s18_s14, %s3125_s15  ;;  %p3131_p2 = scmp.lt.s32.totalorder %s3125_s15, %s3125_s15 }
   0x6   :  { %p3132_p3 = por %p3131_p2, %p3130_p1 }
   0x8   :  { %p3133_p4 = pnand %p3132_p3, %p3126_p0 }
   0xa   :  { %3136 = shalt.err (!%p3133_p4)
}
   0xb   :  { %s3183_s16 = smov [#allocation2]   ;;  %s3184_s17 = smov [#allocation6]  }
   0xc   :  { %20 = dma.vmem_to_smem %s18_s14, 16, %s3183_s16, [#allocation5]  }
   0xd   :  { %s28_s18 = sshll.u32 %s3184_s17, 4  ;;  %s29_s18 = int_to_ptr.vmem [resolvable:$true] %s28_s18 }
   0xe   :  { %s3145_s19 = scalar_lea.vmem %s29_s18, 1792  ;;  %p3150_p6 = scmp.lt.s32.totalorder %s29_s18, %s29_s18 }
   0xf   :  { %p3146_p5 = scmp.ne.s32.totalorder %s29_s18, %s3145_s19  ;;  %p3151_p7 = scmp.lt.s32.totalorder %s3145_s19, %s3145_s19 }
  0x11   :  { %p3152_p8 = por %p3151_p7, %p3150_p6 }
  0x13   :  { %p3153_p9 = pnand %p3152_p8, %p3146_p5 }
  0x15   :  { %3156 = shalt.err (!%p3153_p9)
}
  0x16   :  { %s3185_s0 = smov 128   ;;  %s3186_s20 = smov 8  }
  0x17   :  { %34 = dma.hbm_to_vmem [thread:$0]  %s3637_s2, 1792, %s29_s18, [#allocation3], %s3185_s0, %s3185_s0, %s3186_s20  }
  0x18   :  { %3177 = dma.done.wait [#allocation5], 16  }
  0x19   :  { %3178 = vsyncadd [#allocation5], 4294967280 }
  0x1a   :  { %3179 = dma.done.wait [#allocation3], 1792  }
  0x1b   :  { %3180 = vsyncadd [#allocation3], 4294965504 }
  0x1c   :  { %41 = sfence }
  0x1d   :  { %v45_v0 = vld [vmem:[#allocation6 + $0x8] sm:$0xff]  ;;  %v60_v1 = vld [vmem:[%s3636_s1 + $0x10] sm:$0xff]  ;;  %vm65_vm0 = vcmask 64512   ;;  %v155_v2 = vlaneseq  ;;  %v3187_v3 = vmov 0.0   ;;  %vm3188_vm1 = vmmov 0   ;;  %v3227_v7 = vld [vmem:[#allocation6 + $0x40] sm:$0xff] }
  0x1e   :  { %3056 = vmatprep.subr.mxu1 %v3187_v3  ;;  %2723 = vmatprep.mubr.msk.f32.mxu1 %vm3188_vm1, %v3187_v3  ;;  %v3222_v4 = vld [vmem:[#allocation6 + $0x48] sm:$0xff]  ;;  %v43_v5 = vld [vmem:[#allocation6 + $0x1] sm:$0x1]  ;;  %s164_s2 = sld [smem:[#allocation2]]  ;;  %v3233_v9 = vld [vmem:[#allocation6 + $0x38] sm:$0xff]  ;;  %vm168_vm2 = vcmask 261120  }
  0x1f   :  { %3057 = vmatpush3.msra.mxu1 %v45_v0  ;;  %v156_v6 = vshrl.u32 %v155_v2, 7  ;;  %2715 = vmatprep.subr.mxu0 %v3187_v3  ;;  %3065 = vtanh.f32 %v43_v5  ;;  %v3241_v11 = vld [vmem:[#allocation6 + $0x30] sm:$0xff]  ;;  %v58_v16 = vld [vmem:[%s3636_s1] sm:$0xff]  ;;  %v59_v17 = vld [vmem:[%s3636_s1 + $0x8] sm:$0xff]  ;;  %s2529_s1 = sld [smem:[#allocation2 + $0x1]]  ;;  %s3189_s12 = smov [#allocation7]  }
  0x20   :  { %2724 = vmatmul.mubr.msk.f32.vlgmr.msra.gmra.mxu1 %vm65_vm0, %v60_v1  ;;  %2726 = vmatprep.subr.mxu1 %v3187_v3  ;;  %v3304_v36 = vld [vmem:[#allocation6 + $0x28] sm:$0xff]  ;;  %v3306_v37 = vld [vmem:[#allocation6 + $0x20] sm:$0xff]  ;;  %v3310_v38 = vld [vmem:[#allocation6 + $0x18] sm:$0xff]  ;;  %s2535_s4 = sld [smem:[#allocation2 + $0x2]]  ;;  %s2511_s13 = sshll.u32 %s3189_s12, 4  ;;  %vm2503_vm3 = vcmask 60416   ;;  %s2512_s13 = int_to_ptr.vmem [resolvable:$true] %s2511_s13 }
  0x21   :  { %2727 = vmatpush3.msra.mxu1 %v3222_v4  ;;  %2734 = vmatprep.mubr.msk.f32.mxu1 %vm3188_vm1, %v3187_v3  ;;  %v157_v8 = vsub.s32 0, %v156_v6  ;;  %v3314_v39 = vld [vmem:[#allocation6 + $0x10] sm:$0xff]  ;;  %v3333_v46 = vld [vmem:[#allocation6] ss:$0 sm:$0xff]  ;;  %s2541_s6 = sld [smem:[#allocation2 + $0x3]]  ;;  %s3157_s14 = scalar_lea.vmem %s2512_s13, 64 }
  0x22   :  { %2728 = vmatprep.subr.mxu1 %v3187_v3  ;;  %2716 = vmatpush3.msra.mxu0 %v45_v0  ;;  %s2547_s8 = sld [smem:[#allocation2 + $0x4]]  ;;  %p3158_p10 = scmp.ne.s32.totalorder %s2512_s13, %s3157_s14 }
  0x23   :  { %2729 = vmatpush3.msra.mxu1 %v3227_v7  ;;  %v3236_v10 = vrot.slane %v43_v5, %v157_v8  ;;  %2717 = vmatprep.mubr.msk.f32.mxu0 %vm3188_vm1, %v3187_v3  ;;  %s2553_s10 = sld [smem:[#allocation2 + $0x5]]  ;;  %p3162_p11 = scmp.lt.s32.totalorder %s2512_s13, %s2512_s13 }
  0x24   :  { %2730 = vmatprep.subr.mxu1 %v3187_v3  ;;  %2737 = vmatprep.subr.mxu0 %v3187_v3  ;;  %s165_s25 = smul.f32 0.25, %s164_s2  ;;  %p3163_p12 = scmp.lt.s32.totalorder %s3157_s14, %s3157_s14 }
  0x25   :  { %2731 = vmatpush3.msra.mxu1 %v3233_v9  ;;  %2718 = vmatmul.mubr.msk.f32.vlgmr.msra.gmra.mxu0 %vm65_vm0, %v58_v16  ;;  %s473_s30 = smul.f32 0.25, %s2529_s1 }
  0x26   :  { %2732 = vmatprep.subr.mxu1 %v3187_v3  ;;  %v3248_v13 = vstv %s165_s25  ;;  %2738 = vmatpush3.msra.mxu0 %v3222_v4  ;;  %s858_s5 = smul.f32 0.25, %s2535_s4  ;;  %p3164_p13 = por %p3163_p12, %p3162_p11 }
  0x27   :  { %2733 = vmatpush3.msra.mxu1 %v3241_v11  ;;  %2720 = vmatprep.mubr.msk.f32.mxu0 %vm3188_vm1, %v3187_v3  ;;  %v474_v55 = vstv %s473_s30  ;;  %s1257_s7 = smul.f32 0.25, %s2541_s6 }
  0x28   :  { %2748 = vmatprep.subr.mxu1 %v3187_v3  ;;  %2739 = vmatprep.subr.mxu0 %v3187_v3  ;;  %s1642_s9 = smul.f32 0.25, %s2547_s8  ;;  %p3165_p0 = pnand %p3164_p13, %p3158_p10 }
  0x29   :  { %2740 = vmatpush3.msra.mxu0 %v3227_v7  ;;  %s2041_s11 = smul.f32 0.25, %s2553_s10 }
  0x2a   :  { %2721 = vmatmul.mubr.msk.f32.gmra.mxu0 %vm65_vm0, %v59_v17  ;;  %2741 = vmatprep.subr.mxu0 %v3187_v3 }
  0x2b   :  { %2742 = vmatpush3.msra.mxu0 %v3233_v9  ;;  %2745 = vmatprep.mubr.msk.f32.mxu0 %vm3188_vm1, %v3187_v3 }
  0x2c   :  { %v3066_v12 = vpop.eup %3065  ;;  %2743 = vmatprep.subr.mxu0 %v3187_v3 }
  0x2d   :  { %v163_v14 = vrot.slane %v3066_v12, %v157_v8  ;;  %2744 = vmatpush3.msra.mxu0 %v3241_v11 }
  0x2e   :  { %2759 = vmatprep.subr.mxu0 %v3187_v3 }
  0x2f   :  { %v167_v15 = vmul.f32 %v3248_v13, %v163_v14 }
  0x31   :  { %2735 = vmatmul.mubr.msk.f32.vlgmr.msra.gmra.mxu1 %vm168_vm2, %v167_v15 }
  0x32   :  { %2749 = vmatpush3.msra.mxu1 %v3222_v4  ;;  %2756 = vmatprep.mubr.msk.f32.mxu1 %vm3188_vm1, %v3187_v3 }
  0x33   :  { %2750 = vmatprep.subr.mxu1 %v3187_v3 }
  0x34   :  { %2751 = vmatpush3.msra.mxu1 %v3227_v7 }
  0x35   :  { %2752 = vmatprep.subr.mxu1 %v3187_v3 }
  0x36   :  { %2753 = vmatpush3.msra.mxu1 %v3233_v9 }
  0x37   :  { %2754 = vmatprep.subr.mxu1 %v3187_v3 }
  0x38   :  { %2755 = vmatpush3.msra.mxu1 %v3241_v11 }
  0x39   :  { %2770 = vmatprep.subr.mxu1 %v3187_v3 }
  0xe0   :  { %v3282_v18 = vpop.f32.mrf.mxu1 }
  0xe2   :  { %v2725_v19 = vpop.f32.mrf.mxu1 }
  0xe5   :  { %v141_v26 = vpop.f32.mrf.mxu0 }
  0xe6   :  { %v3336_v47 = vadd.f32 %v3333_v46, %v141_v26 }
  0xe7   :  { %v2719_v27 = vpop.f32.mrf.mxu0 }
  0xea   :  { %v3289_v28 = vpop.f32.mrf.mxu0 }
  0xec   :  { %v2722_v29 = vpop.f32.mrf.mxu0 }
  0xf1   :  { %v238_v20 = vpop.f32.mrf.mxu1 }
  0xf2   :  { %v239_v21 = vadd.f32 %v238_v20, %v3236_v10 }
  0xf3   :  { %v2736_v22 = vpop.f32.mrf.mxu1 }
  0xf4   :  { %3067 = vtanh.f32 %v239_v21 }
 0x101   :  { %v3068_v23 = vpop.eup %3067 }
 0x102   :  { %v243_v24 = vmul.f32 %v3068_v23, %v3248_v13 }
 0x104   :  { %v244_v25 = vadd.f32 %v243_v24, %v167_v15 }
 0x106   :  { %2746 = vmatmul.mubr.msk.f32.vlgmr.msra.gmra.mxu0 %vm168_vm2, %v244_v25 }
 0x107   :  { %2767 = vmatprep.mubr.msk.f32.mxu0 %vm3188_vm1, %v3187_v3  ;;  %2760 = vmatpush3.msra.mxu0 %v3304_v36 }
 0x108   :  { %2761 = vmatprep.subr.mxu0 %v3187_v3 }
 0x109   :  { %2762 = vmatpush3.msra.mxu0 %v3306_v37 }
 0x10a   :  { %2763 = vmatprep.subr.mxu0 %v3187_v3 }
 0x10b   :  { %2764 = vmatpush3.msra.mxu0 %v3310_v38 }
 0x10c   :  { %2765 = vmatprep.subr.mxu0 %v3187_v3 }
 0x10d   :  { %2766 = vmatpush3.msra.mxu0 %v3314_v39 }
 0x10e   :  { %2781 = vmatprep.subr.mxu0 %v3187_v3 }
 0x1c6   :  { %v314_v30 = vpop.f32.mrf.mxu0 }
 0x1c7   :  { %v315_v31 = vadd.f32 %v314_v30, %v3236_v10  ;;  %v859_v30 = vstv %s858_s5 }
 0x1c8   :  { %v2747_v32 = vpop.f32.mrf.mxu0 }
 0x1c9   :  { %3069 = vtanh.f32 %v315_v31 }
 0x1d6   :  { %v3070_v33 = vpop.eup %3069 }
 0x1d7   :  { %v319_v34 = vmul.f32 %v3070_v33, %v3248_v13 }
 0x1d9   :  { %v320_v35 = vadd.f32 %v319_v34, %v244_v25 }
 0x1db   :  { %2757 = vmatmul.mubr.msk.f32.vlgmr.msra.gmra.mxu1 %vm168_vm2, %v320_v35 }
 0x1dc   :  { %2771 = vmatpush3.msra.mxu1 %v3222_v4  ;;  %2778 = vmatprep.mubr.msk.f32.mxu1 %vm3188_vm1, %v3187_v3 }
 0x1dd   :  { %2772 = vmatprep.subr.mxu1 %v3187_v3 }
 0x1de   :  { %2773 = vmatpush3.msra.mxu1 %v3227_v7 }
 0x1df   :  { %2774 = vmatprep.subr.mxu1 %v3187_v3 }
 0x1e0   :  { %2775 = vmatpush3.msra.mxu1 %v3233_v9 }
 0x1e1   :  { %2776 = vmatprep.subr.mxu1 %v3187_v3 }
 0x1e2   :  { %2777 = vmatpush3.msra.mxu1 %v3241_v11 }
 0x1e3   :  { %2792 = vmatprep.subr.mxu1 %v3187_v3 }
 0x29b   :  { %v390_v40 = vpop.f32.mrf.mxu1 }
 0x29c   :  { %v391_v41 = vadd.f32 %v390_v40, %v3236_v10 }
 0x29d   :  { %v2758_v42 = vpop.f32.mrf.mxu1 }
 0x29e   :  { %3071 = vtanh.f32 %v391_v41 }
 0x2ab   :  { %v3072_v43 = vpop.eup %3071 }
 0x2ac   :  { %v395_v44 = vmul.f32 %v3072_v43, %v3248_v13 }
 0x2ae   :  { %v396_v45 = vadd.f32 %v395_v44, %v320_v35 }
 0x2b0   :  { %2768 = vmatmul.mubr.msk.f32.vlgmr.msra.gmra.mxu0 %vm168_vm2, %v396_v45 }
 0x2b1   :  { %2782 = vmatpush3.msra.mxu0 %v3222_v4  ;;  %2789 = vmatprep.mubr.msk.f32.mxu0 %vm3188_vm1, %v3187_v3 }
 0x2b2   :  { %2783 = vmatprep.subr.mxu0 %v3187_v3 }
 0x2b3   :  { %2784 = vmatpush3.msra.mxu0 %v3227_v7 }
 0x2b4   :  { %2785 = vmatprep.subr.mxu0 %v3187_v3 }
 0x2b5   :  { %2786 = vmatpush3.msra.mxu0 %v3233_v9 }
 0x2b6   :  { %2787 = vmatprep.subr.mxu0 %v3187_v3 }
 0x2b7   :  { %2788 = vmatpush3.msra.mxu0 %v3241_v11 }
 0x2b8   :  { %2803 = vmatprep.subr.mxu0 %v3187_v3 }
 0x370   :  { %v466_v48 = vpop.f32.mrf.mxu0 }
 0x371   :  { %v470_v49 = vadd.f32 %v466_v48, %v3336_v47 }
 0x372   :  { %v2769_v50 = vpop.f32.mrf.mxu0 }
 0x373   :  { %3073 = vtanh.f32 %v470_v49 }
 0x380   :  { %v3074_v51 = vpop.eup %3073 }
 0x381   :  { %2779 = vmatmul.mubr.msk.f32.vlgmr.msra.gmra.mxu1 %vm168_vm2, %v3074_v51 }
 0x382   :  { %2793 = vmatpush3.msra.mxu1 %v3222_v4  ;;  %2800 = vmatprep.mubr.msk.f32.mxu1 %vm3188_vm1, %v3187_v3 }
 0x383   :  { %2794 = vmatprep.subr.mxu1 %v3187_v3 }
 0x384   :  { %2795 = vmatpush3.msra.mxu1 %v3227_v7 }
 0x385   :  { %2796 = vmatprep.subr.mxu1 %v3187_v3 }
 0x386   :  { %2797 = vmatpush3.msra.mxu1 %v3233_v9 }
 0x387   :  { %2798 = vmatprep.subr.mxu1 %v3187_v3 }
 0x388   :  { %2799 = vmatpush3.msra.mxu1 %v3241_v11 }
 0x389   :  { %2814 = vmatprep.subr.mxu1 %v3187_v3 }
 0x441   :  { %v544_v52 = vpop.f32.mrf.mxu1 }
 0x442   :  { %v545_v53 = vadd.f32 %v544_v52, %v3236_v10 }
 0x443   :  { %v2780_v54 = vpop.f32.mrf.mxu1 }
 0x444   :  { %3075 = vtanh.f32 %v545_v53 }
 0x451   :  { %v3076_v56 = vpop.eup %3075 }
 0x452   :  { %v549_v57 = vmul.f32 %v3076_v56, %v474_v55 }
 0x454   :  { %v550_v58 = vadd.f32 %v3074_v51, %v549_v57 }
 0x456   :  { %2790 = vmatmul.mubr.msk.f32.vlgmr.msra.gmra.mxu0 %vm168_vm2, %v550_v58 }
 0x457   :  { %2804 = vmatpush3.msra.mxu0 %v3222_v4  ;;  %2811 = vmatprep.mubr.msk.f32.mxu0 %vm3188_vm1, %v3187_v3 }
 0x458   :  { %2805 = vmatprep.subr.mxu0 %v3187_v3 }
 0x459   :  { %2806 = vmatpush3.msra.mxu0 %v3227_v7 }
 0x45a   :  { %2807 = vmatprep.subr.mxu0 %v3187_v3 }
 0x45b   :  { %2808 = vmatpush3.msra.mxu0 %v3233_v9 }
 0x45c   :  { %2809 = vmatprep.subr.mxu0 %v3187_v3 }
 0x45d   :  { %2810 = vmatpush3.msra.mxu0 %v3241_v11 }
 0x45e   :  { %2825 = vmatprep.subr.mxu0 %v3187_v3 }
 0x516   :  { %v620_v59 = vpop.f32.mrf.mxu0 }
 0x517   :  { %v621_v60 = vadd.f32 %v620_v59, %v3236_v10 }
 0x518   :  { %v2791_v61 = vpop.f32.mrf.mxu0 }
 0x519   :  { %3077 = vtanh.f32 %v621_v60 }
 0x526   :  { %v3078_v62 = vpop.eup %3077 }
 0x527   :  { %v625_v63 = vmul.f32 %v3078_v62, %v474_v55 }
 0x529   :  { %v626_v0 = vadd.f32 %v625_v63, %v550_v58 }
 0x52b   :  { %2801 = vmatmul.mubr.msk.f32.vlgmr.msra.gmra.mxu1 %vm168_vm2, %v626_v0 }
 0x52c   :  { %2815 = vmatpush3.msra.mxu1 %v3304_v36  ;;  %2822 = vmatprep.mubr.msk.f32.mxu1 %vm3188_vm1, %v3187_v3 }
 0x52d   :  { %2816 = vmatprep.subr.mxu1 %v3187_v3 }
 0x52e   :  { %2817 = vmatpush3.msra.mxu1 %v3306_v37 }
 0x52f   :  { %2818 = vmatprep.subr.mxu1 %v3187_v3 }
 0x530   :  { %2819 = vmatpush3.msra.mxu1 %v3310_v38 }
 0x531   :  { %2820 = vmatprep.subr.mxu1 %v3187_v3 }
 0x532   :  { %2821 = vmatpush3.msra.mxu1 %v3314_v39 }
 0x533   :  { %2836 = vmatprep.subr.mxu1 %v3187_v3 }
 0x5eb   :  { %v696_v1 = vpop.f32.mrf.mxu1 }
 0x5ec   :  { %v697_v2 = vadd.f32 %v696_v1, %v3236_v10  ;;  %v3460_v1 = vadd.f32 %v3333_v46, %v3289_v28 }
 0x5ed   :  { %v2802_v5 = vpop.f32.mrf.mxu1 }
 0x5ee   :  { %3079 = vtanh.f32 %v697_v2 }
 0x5fb   :  { %v3080_v6 = vpop.eup %3079 }
 0x5fc   :  { %v701_v8 = vmul.f32 %v3080_v6, %v474_v55 }
 0x5fe   :  { %v702_v12 = vadd.f32 %v701_v8, %v626_v0 }
 0x600   :  { %2812 = vmatmul.mubr.msk.f32.vlgmr.msra.gmra.mxu0 %vm168_vm2, %v702_v12 }
 0x601   :  { %2826 = vmatpush3.msra.mxu0 %v3222_v4  ;;  %2833 = vmatprep.mubr.msk.f32.mxu0 %vm3188_vm1, %v3187_v3 }
 0x602   :  { %2827 = vmatprep.subr.mxu0 %v3187_v3 }
 0x603   :  { %2828 = vmatpush3.msra.mxu0 %v3227_v7 }
 0x604   :  { %2829 = vmatprep.subr.mxu0 %v3187_v3 }
 0x605   :  { %2830 = vmatpush3.msra.mxu0 %v3233_v9 }
 0x606   :  { %2831 = vmatprep.subr.mxu0 %v3187_v3 }
 0x607   :  { %2832 = vmatpush3.msra.mxu0 %v3241_v11 }
 0x608   :  { %2847 = vmatprep.subr.mxu0 %v3187_v3 }
 0x6c0   :  { %v772_v13 = vpop.f32.mrf.mxu0 }
 0x6c1   :  { %v773_v14 = vadd.f32 %v772_v13, %v3236_v10 }
 0x6c2   :  { %v2813_v15 = vpop.f32.mrf.mxu0 }
 0x6c3   :  { %3081 = vtanh.f32 %v773_v14  ;;  %v1258_v14 = vstv %s1257_s7 }
 0x6d0   :  { %v3082_v16 = vpop.eup %3081 }
 0x6d1   :  { %v777_v17 = vmul.f32 %v3082_v16, %v474_v55 }
 0x6d3   :  { %v778_v19 = vadd.f32 %v777_v17, %v702_v12 }
 0x6d5   :  { %2823 = vmatmul.mubr.msk.f32.vlgmr.msra.gmra.mxu1 %vm168_vm2, %v778_v19 }
 0x6d6   :  { %2837 = vmatpush3.msra.mxu1 %v3222_v4  ;;  %2844 = vmatprep.mubr.msk.f32.mxu1 %vm3188_vm1, %v3187_v3 }
 0x6d7   :  { %2838 = vmatprep.subr.mxu1 %v3187_v3 }
 0x6d8   :  { %2839 = vmatpush3.msra.mxu1 %v3227_v7 }
 0x6d9   :  { %2840 = vmatprep.subr.mxu1 %v3187_v3 }
 0x6da   :  { %2841 = vmatpush3.msra.mxu1 %v3233_v9 }
 0x6db   :  { %2842 = vmatprep.subr.mxu1 %v3187_v3 }
 0x6dc   :  { %2843 = vmatpush3.msra.mxu1 %v3241_v11 }
 0x6dd   :  { %2858 = vmatprep.subr.mxu1 %v3187_v3 }
 0x795   :  { %v848_v20 = vpop.f32.mrf.mxu1 }
 0x796   :  { %v853_v21 = vrot.slane %v848_v20, 4 }
 0x797   :  { %v2824_v22 = vpop.f32.mrf.mxu1 }
 0x798   :  { %v855_v23 = vadd.f32 %v853_v21, %v3336_v47 }
 0x79a   :  { %3083 = vtanh.f32 %v855_v23 }
 0x7a7   :  { %v3084_v24 = vpop.eup %3083 }
 0x7a8   :  { %v861_v25 = vrot.slane %v3084_v24, 4 }
 0x7aa   :  { %2834 = vmatmul.mubr.msk.f32.vlgmr.msra.gmra.mxu0 %vm168_vm2, %v861_v25 }
 0x7ab   :  { %2848 = vmatpush3.msra.mxu0 %v3222_v4  ;;  %2855 = vmatprep.mubr.msk.f32.mxu0 %vm3188_vm1, %v3187_v3 }
 0x7ac   :  { %2849 = vmatprep.subr.mxu0 %v3187_v3 }
 0x7ad   :  { %2850 = vmatpush3.msra.mxu0 %v3227_v7 }
 0x7ae   :  { %2851 = vmatprep.subr.mxu0 %v3187_v3 }
 0x7af   :  { %2852 = vmatpush3.msra.mxu0 %v3233_v9 }
 0x7b0   :  { %2853 = vmatprep.subr.mxu0 %v3187_v3 }
 0x7b1   :  { %2854 = vmatpush3.msra.mxu0 %v3241_v11 }
 0x7b2   :  { %2869 = vmatprep.subr.mxu0 %v3187_v3 }
 0x86a   :  { %v930_v26 = vpop.f32.mrf.mxu0 }
 0x86b   :  { %v931_v27 = vadd.f32 %v930_v26, %v3236_v10 }
 0x86c   :  { %v2835_v29 = vpop.f32.mrf.mxu0 }
 0x86d   :  { %3085 = vtanh.f32 %v931_v27 }
 0x87a   :  { %v3086_v31 = vpop.eup %3085 }
 0x87b   :  { %v935_v32 = vmul.f32 %v3086_v31, %v859_v30 }
 0x87d   :  { %v937_v33 = vrot.slane %v935_v32, 4 }
 0x87f   :  { %v939_v34 = vadd.f32 %v3084_v24, %v937_v33 }
 0x881   :  { %v941_v35 = vrot.slane %v939_v34, 4 }
 0x883   :  { %2845 = vmatmul.mubr.msk.f32.vlgmr.msra.gmra.mxu1 %vm168_vm2, %v941_v35 }
 0x884   :  { %2859 = vmatpush3.msra.mxu1 %v3222_v4  ;;  %2866 = vmatprep.mubr.msk.f32.mxu1 %vm3188_vm1, %v3187_v3 }
 0x885   :  { %2860 = vmatprep.subr.mxu1 %v3187_v3 }
 0x886   :  { %2861 = vmatpush3.msra.mxu1 %v3227_v7 }
 0x887   :  { %2862 = vmatprep.subr.mxu1 %v3187_v3 }
 0x888   :  { %2863 = vmatpush3.msra.mxu1 %v3233_v9 }
 0x889   :  { %2864 = vmatprep.subr.mxu1 %v3187_v3 }
 0x88a   :  { %2865 = vmatpush3.msra.mxu1 %v3241_v11 }
 0x88b   :  { %2880 = vmatprep.subr.mxu1 %v3187_v3 }
 0x943   :  { %v1010_v40 = vpop.f32.mrf.mxu1 }
 0x944   :  { %v1011_v41 = vadd.f32 %v1010_v40, %v3236_v10 }
 0x945   :  { %v2846_v42 = vpop.f32.mrf.mxu1 }
 0x946   :  { %3087 = vtanh.f32 %v1011_v41 }
 0x953   :  { %v3088_v43 = vpop.eup %3087 }
 0x954   :  { %v1015_v44 = vmul.f32 %v3088_v43, %v859_v30 }
 0x956   :  { %v1017_v45 = vrot.slane %v1015_v44, 4 }
 0x958   :  { %v1019_v47 = vadd.f32 %v1017_v45, %v939_v34 }
 0x95a   :  { %v1021_v48 = vrot.slane %v1019_v47, 4 }
 0x95c   :  { %2856 = vmatmul.mubr.msk.f32.vlgmr.msra.gmra.mxu0 %vm168_vm2, %v1021_v48 }
 0x95d   :  { %2870 = vmatpush3.msra.mxu0 %v3304_v36  ;;  %2877 = vmatprep.mubr.msk.f32.mxu0 %vm3188_vm1, %v3187_v3 }
 0x95e   :  { %2871 = vmatprep.subr.mxu0 %v3187_v3 }
 0x95f   :  { %2872 = vmatpush3.msra.mxu0 %v3306_v37 }
 0x960   :  { %2873 = vmatprep.subr.mxu0 %v3187_v3 }
 0x961   :  { %2874 = vmatpush3.msra.mxu0 %v3310_v38 }
 0x962   :  { %2875 = vmatprep.subr.mxu0 %v3187_v3 }
 0x963   :  { %2876 = vmatpush3.msra.mxu0 %v3314_v39 }
 0x964   :  { %2891 = vmatprep.subr.mxu0 %v3187_v3 }
 0xa1c   :  { %v1090_v49 = vpop.f32.mrf.mxu0 }
 0xa1d   :  { %v1091_v50 = vadd.f32 %v1090_v49, %v3236_v10 }
 0xa1e   :  { %v2857_v51 = vpop.f32.mrf.mxu0 }
 0xa1f   :  { %3089 = vtanh.f32 %v1091_v50 }
 0xa2c   :  { %v3090_v52 = vpop.eup %3089 }
 0xa2d   :  { %v1095_v53 = vmul.f32 %v3090_v52, %v859_v30  ;;  %v1643_v52 = vstv %s1642_s9 }
 0xa2f   :  { %v1097_v54 = vrot.slane %v1095_v53, 4 }
 0xa31   :  { %v1099_v55 = vadd.f32 %v1097_v54, %v1019_v47 }
 0xa33   :  { %v1101_v56 = vrot.slane %v1099_v55, 4 }
 0xa35   :  { %2867 = vmatmul.mubr.msk.f32.vlgmr.msra.gmra.mxu1 %vm168_vm2, %v1101_v56 }
 0xa36   :  { %2881 = vmatpush3.msra.mxu1 %v3222_v4  ;;  %2888 = vmatprep.mubr.msk.f32.mxu1 %vm3188_vm1, %v3187_v3 }
 0xa37   :  { %2882 = vmatprep.subr.mxu1 %v3187_v3 }
 0xa38   :  { %2883 = vmatpush3.msra.mxu1 %v3227_v7 }
 0xa39   :  { %2884 = vmatprep.subr.mxu1 %v3187_v3 }
 0xa3a   :  { %2885 = vmatpush3.msra.mxu1 %v3233_v9 }
 0xa3b   :  { %2886 = vmatprep.subr.mxu1 %v3187_v3 }
 0xa3c   :  { %2887 = vmatpush3.msra.mxu1 %v3241_v11 }
 0xa3d   :  { %2902 = vmatprep.subr.mxu1 %v3187_v3 }
 0xaf5   :  { %v1170_v57 = vpop.f32.mrf.mxu1 }
 0xaf6   :  { %v1171_v58 = vadd.f32 %v1170_v57, %v3236_v10 }
 0xaf7   :  { %v2868_v59 = vpop.f32.mrf.mxu1 }
 0xaf8   :  { %3091 = vtanh.f32 %v1171_v58 }
 0xb05   :  { %v3092_v60 = vpop.eup %3091 }
 0xb06   :  { %v1175_v61 = vmul.f32 %v3092_v60, %v859_v30 }
 0xb08   :  { %v1177_v62 = vrot.slane %v1175_v61, 4 }
 0xb0a   :  { %v1179_v63 = vadd.f32 %v1177_v62, %v1099_v55 }
 0xb0c   :  { %v1181_v0 = vrot.slane %v1179_v63, 4 }
 0xb0e   :  { %2878 = vmatmul.mubr.msk.f32.vlgmr.msra.gmra.mxu0 %vm168_vm2, %v1181_v0 }
 0xb0f   :  { %2892 = vmatpush3.msra.mxu0 %v3222_v4  ;;  %2899 = vmatprep.mubr.msk.f32.mxu0 %vm3188_vm1, %v3187_v3 }
 0xb10   :  { %2893 = vmatprep.subr.mxu0 %v3187_v3 }
 0xb11   :  { %2894 = vmatpush3.msra.mxu0 %v3227_v7 }
 0xb12   :  { %2895 = vmatprep.subr.mxu0 %v3187_v3 }
 0xb13   :  { %2896 = vmatpush3.msra.mxu0 %v3233_v9 }
 0xb14   :  { %2897 = vmatprep.subr.mxu0 %v3187_v3 }
 0xb15   :  { %2898 = vmatpush3.msra.mxu0 %v3241_v11 }
 0xb16   :  { %2913 = vmatprep.subr.mxu0 %v3187_v3 }
 0xbce   :  { %v1250_v2 = vpop.f32.mrf.mxu0 }
 0xbcf   :  { %v1254_v5 = vadd.f32 %v1250_v2, %v3460_v1 }
 0xbd0   :  { %v2879_v6 = vpop.f32.mrf.mxu0 }
 0xbd1   :  { %3093 = vtanh.f32 %v1254_v5 }
 0xbde   :  { %v3094_v8 = vpop.eup %3093 }
 0xbdf   :  { %2889 = vmatmul.mubr.msk.f32.vlgmr.msra.gmra.mxu1 %vm168_vm2, %v3094_v8 }
 0xbe0   :  { %2903 = vmatpush3.msra.mxu1 %v3222_v4  ;;  %2910 = vmatprep.mubr.msk.f32.mxu1 %vm3188_vm1, %v3187_v3 }
 0xbe1   :  { %2904 = vmatprep.subr.mxu1 %v3187_v3 }
 0xbe2   :  { %2905 = vmatpush3.msra.mxu1 %v3227_v7 }
 0xbe3   :  { %2906 = vmatprep.subr.mxu1 %v3187_v3 }
 0xbe4   :  { %2907 = vmatpush3.msra.mxu1 %v3233_v9 }
 0xbe5   :  { %2908 = vmatprep.subr.mxu1 %v3187_v3 }
 0xbe6   :  { %2909 = vmatpush3.msra.mxu1 %v3241_v11 }
 0xbe7   :  { %2924 = vmatprep.subr.mxu1 %v3187_v3 }
 0xc9f   :  { %v1328_v28 = vpop.f32.mrf.mxu1 }
 0xca0   :  { %v1329_v12 = vadd.f32 %v1328_v28, %v3236_v10 }
 0xca1   :  { %v2890_v13 = vpop.f32.mrf.mxu1 }
 0xca2   :  { %3095 = vtanh.f32 %v1329_v12 }
 0xcaf   :  { %v3096_v15 = vpop.eup %3095 }
 0xcb0   :  { %v1333_v16 = vmul.f32 %v3096_v15, %v1258_v14 }
 0xcb2   :  { %v1334_v17 = vadd.f32 %v3094_v8, %v1333_v16 }
 0xcb4   :  { %2900 = vmatmul.mubr.msk.f32.vlgmr.msra.gmra.mxu0 %vm168_vm2, %v1334_v17 }
 0xcb5   :  { %2914 = vmatpush3.msra.mxu0 %v3222_v4  ;;  %2921 = vmatprep.mubr.msk.f32.mxu0 %vm3188_vm1, %v3187_v3 }
 0xcb6   :  { %2915 = vmatprep.subr.mxu0 %v3187_v3 }
 0xcb7   :  { %2916 = vmatpush3.msra.mxu0 %v3227_v7 }
 0xcb8   :  { %2917 = vmatprep.subr.mxu0 %v3187_v3 }
 0xcb9   :  { %2918 = vmatpush3.msra.mxu0 %v3233_v9 }
 0xcba   :  { %2919 = vmatprep.subr.mxu0 %v3187_v3 }
 0xcbb   :  { %2920 = vmatpush3.msra.mxu0 %v3241_v11 }
 0xcbc   :  { %2935 = vmatprep.subr.mxu0 %v3187_v3 }
 0xd74   :  { %v1404_v19 = vpop.f32.mrf.mxu0 }
 0xd75   :  { %v1405_v20 = vadd.f32 %v1404_v19, %v3236_v10 }
 0xd76   :  { %v2901_v21 = vpop.f32.mrf.mxu0 }
 0xd77   :  { %3097 = vtanh.f32 %v1405_v20 }
 0xd84   :  { %v3098_v22 = vpop.eup %3097 }
 0xd85   :  { %v1409_v23 = vmul.f32 %v3098_v22, %v1258_v14 }
 0xd87   :  { %v1410_v24 = vadd.f32 %v1409_v23, %v1334_v17 }
 0xd89   :  { %2911 = vmatmul.mubr.msk.f32.vlgmr.msra.gmra.mxu1 %vm168_vm2, %v1410_v24 }
 0xd8a   :  { %2925 = vmatpush3.msra.mxu1 %v3304_v36  ;;  %2932 = vmatprep.mubr.msk.f32.mxu1 %vm3188_vm1, %v3187_v3 }
 0xd8b   :  { %2926 = vmatprep.subr.mxu1 %v3187_v3 }
 0xd8c   :  { %2927 = vmatpush3.msra.mxu1 %v3306_v37 }
 0xd8d   :  { %2928 = vmatprep.subr.mxu1 %v3187_v3 }
 0xd8e   :  { %2929 = vmatpush3.msra.mxu1 %v3310_v38 }
 0xd8f   :  { %2930 = vmatprep.subr.mxu1 %v3187_v3 }
 0xd90   :  { %2931 = vmatpush3.msra.mxu1 %v3314_v39 }
 0xd91   :  { %2946 = vmatprep.subr.mxu1 %v3187_v3 }
 0xe49   :  { %v1480_v25 = vpop.f32.mrf.mxu1 }
 0xe4a   :  { %v1481_v26 = vadd.f32 %v1480_v25, %v3236_v10 }
 0xe4b   :  { %v2912_v27 = vpop.f32.mrf.mxu1 }
 0xe4c   :  { %3099 = vtanh.f32 %v1481_v26 }
 0xe59   :  { %v3100_v29 = vpop.eup %3099 }
 0xe5a   :  { %v1485_v30 = vmul.f32 %v3100_v29, %v1258_v14 }
 0xe5c   :  { %v1486_v31 = vadd.f32 %v1485_v30, %v1410_v24  ;;  %v3584_v24 = vadd.f32 %v3333_v46, %v3282_v18 }
 0xe5e   :  { %2922 = vmatmul.mubr.msk.f32.vlgmr.msra.gmra.mxu0 %vm168_vm2, %v1486_v31 }
 0xe5f   :  { %2936 = vmatpush3.msra.mxu0 %v3222_v4  ;;  %2943 = vmatprep.mubr.msk.f32.mxu0 %vm3188_vm1, %v3187_v3 }
 0xe60   :  { %2937 = vmatprep.subr.mxu0 %v3187_v3 }
 0xe61   :  { %2938 = vmatpush3.msra.mxu0 %v3227_v7 }
 0xe62   :  { %2939 = vmatprep.subr.mxu0 %v3187_v3 }
 0xe63   :  { %2940 = vmatpush3.msra.mxu0 %v3233_v9 }
 0xe64   :  { %2941 = vmatprep.subr.mxu0 %v3187_v3 }
 0xe65   :  { %2942 = vmatpush3.msra.mxu0 %v3241_v11 }
 0xe66   :  { %2957 = vmatprep.subr.mxu0 %v3187_v3 }
 0xf1e   :  { %v1556_v32 = vpop.f32.mrf.mxu0 }
 0xf1f   :  { %v1557_v33 = vadd.f32 %v1556_v32, %v3236_v10 }
 0xf20   :  { %v2923_v34 = vpop.f32.mrf.mxu0 }
 0xf21   :  { %3101 = vtanh.f32 %v1557_v33 }
 0xf2e   :  { %v3102_v35 = vpop.eup %3101 }
 0xf2f   :  { %v1561_v40 = vmul.f32 %v3102_v35, %v1258_v14 }
 0xf31   :  { %v1562_v41 = vadd.f32 %v1561_v40, %v1486_v31  ;;  %v2042_v31 = vstv %s2041_s11 }
 0xf33   :  { %2933 = vmatmul.mubr.msk.f32.vlgmr.msra.gmra.mxu1 %vm168_vm2, %v1562_v41 }
 0xf34   :  { %2947 = vmatpush3.msra.mxu1 %v3222_v4  ;;  %2954 = vmatprep.mubr.msk.f32.mxu1 %vm3188_vm1, %v3187_v3 }
 0xf35   :  { %2948 = vmatprep.subr.mxu1 %v3187_v3 }
 0xf36   :  { %2949 = vmatpush3.msra.mxu1 %v3227_v7 }
 0xf37   :  { %2950 = vmatprep.subr.mxu1 %v3187_v3 }
 0xf38   :  { %2951 = vmatpush3.msra.mxu1 %v3233_v9 }
 0xf39   :  { %2952 = vmatprep.subr.mxu1 %v3187_v3 }
 0xf3a   :  { %2953 = vmatpush3.msra.mxu1 %v3241_v11 }
 0xf3b   :  { %2968 = vmatprep.subr.mxu1 %v3187_v3 }
 0xff3   :  { %v1632_v42 = vpop.f32.mrf.mxu1 }
 0xff4   :  { %v1637_v43 = vrot.slane %v1632_v42, 4 }
 0xff5   :  { %v2934_v44 = vpop.f32.mrf.mxu1 }
 0xff6   :  { %v1639_v45 = vadd.f32 %v1637_v43, %v3460_v1 }
 0xff8   :  { %3103 = vtanh.f32 %v1639_v45 }
0x1005   :  { %v3104_v47 = vpop.eup %3103 }
0x1006   :  { %v1645_v48 = vrot.slane %v3104_v47, 4 }
0x1008   :  { %2944 = vmatmul.mubr.msk.f32.vlgmr.msra.gmra.mxu0 %vm168_vm2, %v1645_v48 }
0x1009   :  { %2958 = vmatpush3.msra.mxu0 %v3222_v4  ;;  %2965 = vmatprep.mubr.msk.f32.mxu0 %vm3188_vm1, %v3187_v3 }
0x100a   :  { %2959 = vmatprep.subr.mxu0 %v3187_v3 }
0x100b   :  { %2960 = vmatpush3.msra.mxu0 %v3227_v7 }
0x100c   :  { %2961 = vmatprep.subr.mxu0 %v3187_v3 }
0x100d   :  { %2962 = vmatpush3.msra.mxu0 %v3233_v9 }
0x100e   :  { %2963 = vmatprep.subr.mxu0 %v3187_v3 }
0x100f   :  { %2964 = vmatpush3.msra.mxu0 %v3241_v11 }
0x1010   :  { %2979 = vmatprep.subr.mxu0 %v3187_v3 }
0x10c8   :  { %v1714_v49 = vpop.f32.mrf.mxu0 }
0x10c9   :  { %v1715_v50 = vadd.f32 %v1714_v49, %v3236_v10 }
0x10ca   :  { %v2945_v51 = vpop.f32.mrf.mxu0 }
0x10cb   :  { %3105 = vtanh.f32 %v1715_v50  ;;  %v57_v50 = vld [vmem:[#allocation6 + $0x68] sm:$0xff]  ;;  %v56_v51 = vld [vmem:[#allocation6 + $0x60] sm:$0xff] }
0x10d8   :  { %v3106_v53 = vpop.eup %3105 }
0x10d9   :  { %v1719_v54 = vmul.f32 %v3106_v53, %v1643_v52 }
0x10db   :  { %v1721_v55 = vrot.slane %v1719_v54, 4 }
0x10dd   :  { %v1723_v56 = vadd.f32 %v3104_v47, %v1721_v55 }
0x10df   :  { %v1725_v57 = vrot.slane %v1723_v56, 4 }
0x10e1   :  { %2955 = vmatmul.mubr.msk.f32.vlgmr.msra.gmra.mxu1 %vm168_vm2, %v1725_v57 }
0x10e2   :  { %2969 = vmatpush3.msra.mxu1 %v3222_v4  ;;  %2976 = vmatprep.mubr.msk.f32.mxu1 %vm3188_vm1, %v3187_v3 }
0x10e3   :  { %2970 = vmatprep.subr.mxu1 %v3187_v3 }
0x10e4   :  { %2971 = vmatpush3.msra.mxu1 %v3227_v7 }
0x10e5   :  { %2972 = vmatprep.subr.mxu1 %v3187_v3 }
0x10e6   :  { %2973 = vmatpush3.msra.mxu1 %v3233_v9 }
0x10e7   :  { %2974 = vmatprep.subr.mxu1 %v3187_v3 }
0x10e8   :  { %2975 = vmatpush3.msra.mxu1 %v3241_v11 }
0x10e9   :  { %2990 = vmatprep.subr.mxu1 %v3187_v3 }
0x11a1   :  { %v1794_v58 = vpop.f32.mrf.mxu1 }
0x11a2   :  { %v1795_v59 = vadd.f32 %v1794_v58, %v3236_v10 }
0x11a3   :  { %v2956_v60 = vpop.f32.mrf.mxu1 }
0x11a4   :  { %3107 = vtanh.f32 %v1795_v59  ;;  %v2559_v59 = vld [vmem:[#allocation6 + $0x2] ss:$0 sm:$0xff] }
0x11b1   :  { %v3108_v61 = vpop.eup %3107 }
0x11b2   :  { %v1799_v62 = vmul.f32 %v3108_v61, %v1643_v52 }
0x11b4   :  { %v1801_v63 = vrot.slane %v1799_v62, 4 }
0x11b6   :  { %v1803_v0 = vadd.f32 %v1801_v63, %v1723_v56 }
0x11b8   :  { %v1805_v1 = vrot.slane %v1803_v0, 4 }
0x11ba   :  { %2966 = vmatmul.mubr.msk.f32.vlgmr.msra.gmra.mxu0 %vm168_vm2, %v1805_v1 }
0x11bb   :  { %2980 = vmatpush3.msra.mxu0 %v3304_v36  ;;  %2987 = vmatprep.mubr.msk.f32.mxu0 %vm3188_vm1, %v3187_v3 }
0x11bc   :  { %2981 = vmatprep.subr.mxu0 %v3187_v3 }
0x11bd   :  { %2982 = vmatpush3.msra.mxu0 %v3306_v37 }
0x11be   :  { %2983 = vmatprep.subr.mxu0 %v3187_v3 }
0x11bf   :  { %2984 = vmatpush3.msra.mxu0 %v3310_v38 }
0x11c0   :  { %2985 = vmatprep.subr.mxu0 %v3187_v3 }
0x11c1   :  { %2986 = vmatpush3.msra.mxu0 %v3314_v39 }
0x11c2   :  { %3001 = vmatprep.subr.mxu0 %v3187_v3 }
0x127a   :  { %v1874_v2 = vpop.f32.mrf.mxu0 }
0x127b   :  { %v1875_v5 = vadd.f32 %v1874_v2, %v3236_v10 }
0x127c   :  { %v2967_v6 = vpop.f32.mrf.mxu0 }
0x127d   :  { %3109 = vtanh.f32 %v1875_v5 }
0x128a   :  { %v3110_v8 = vpop.eup %3109 }
0x128b   :  { %v1879_v28 = vmul.f32 %v3110_v8, %v1643_v52 }
0x128d   :  { %v1881_v12 = vrot.slane %v1879_v28, 4 }
0x128f   :  { %v1883_v13 = vadd.f32 %v1881_v12, %v1803_v0 }
0x1291   :  { %v1885_v14 = vrot.slane %v1883_v13, 4 }
0x1293   :  { %2977 = vmatmul.mubr.msk.f32.vlgmr.msra.gmra.mxu1 %vm168_vm2, %v1885_v14 }
0x1294   :  { %2991 = vmatpush3.msra.mxu1 %v3222_v4  ;;  %2998 = vmatprep.mubr.msk.f32.mxu1 %vm3188_vm1, %v3187_v3 }
0x1295   :  { %2992 = vmatprep.subr.mxu1 %v3187_v3 }
0x1296   :  { %2993 = vmatpush3.msra.mxu1 %v3227_v7 }
0x1297   :  { %2994 = vmatprep.subr.mxu1 %v3187_v3 }
0x1298   :  { %2995 = vmatpush3.msra.mxu1 %v3233_v9 }
0x1299   :  { %2996 = vmatprep.subr.mxu1 %v3187_v3 }
0x129a   :  { %2997 = vmatpush3.msra.mxu1 %v3241_v11 }
0x129b   :  { %3012 = vmatprep.subr.mxu1 %v3187_v3 }
0x1353   :  { %v1954_v15 = vpop.f32.mrf.mxu1 }
0x1354   :  { %v1955_v16 = vadd.f32 %v1954_v15, %v3236_v10 }
0x1355   :  { %v2978_v17 = vpop.f32.mrf.mxu1 }
0x1356   :  { %3111 = vtanh.f32 %v1955_v16 }
0x1363   :  { %v3112_v19 = vpop.eup %3111 }
0x1364   :  { %v1959_v20 = vmul.f32 %v3112_v19, %v1643_v52  ;;  %v55_v52 = vld [vmem:[#allocation6 + $0x58] sm:$0xff] }
0x1366   :  { %v1961_v21 = vrot.slane %v1959_v20, 4 }
0x1368   :  { %v1963_v22 = vadd.f32 %v1961_v21, %v1883_v13 }
0x136a   :  { %v1965_v23 = vrot.slane %v1963_v22, 4 }
0x136c   :  { %2988 = vmatmul.mubr.msk.f32.vlgmr.msra.gmra.mxu0 %vm168_vm2, %v1965_v23 }
0x136d   :  { %3002 = vmatpush3.msra.mxu0 %v3222_v4  ;;  %3009 = vmatprep.mubr.msk.f32.mxu0 %vm3188_vm1, %v3187_v3 }
0x136e   :  { %3003 = vmatprep.subr.mxu0 %v3187_v3 }
0x136f   :  { %3004 = vmatpush3.msra.mxu0 %v3227_v7 }
0x1370   :  { %3005 = vmatprep.subr.mxu0 %v3187_v3 }
0x1371   :  { %3006 = vmatpush3.msra.mxu0 %v3233_v9 }
0x1372   :  { %3007 = vmatprep.subr.mxu0 %v3187_v3 }
0x1373   :  { %3008 = vmatpush3.msra.mxu0 %v3241_v11 }
0x1374   :  { %3023 = vmatprep.subr.mxu0 %v3187_v3 }
0x142c   :  { %v2034_v25 = vpop.f32.mrf.mxu0 }
0x142d   :  { %v2038_v26 = vadd.f32 %v2034_v25, %v3584_v24 }
0x142e   :  { %v2989_v27 = vpop.f32.mrf.mxu0 }
0x142f   :  { %3113 = vtanh.f32 %v2038_v26 }
0x143c   :  { %v3114_v29 = vpop.eup %3113 }
0x143d   :  { %2999 = vmatmul.mubr.msk.f32.vlgmr.msra.gmra.mxu1 %vm168_vm2, %v3114_v29 }
0x143e   :  { %3013 = vmatpush3.msra.mxu1 %v3222_v4  ;;  %3020 = vmatprep.mubr.msk.f32.mxu1 %vm3188_vm1, %v3187_v3 }
0x143f   :  { %3014 = vmatprep.subr.mxu1 %v3187_v3 }
0x1440   :  { %3015 = vmatpush3.msra.mxu1 %v3227_v7 }
0x1441   :  { %3016 = vmatprep.subr.mxu1 %v3187_v3 }
0x1442   :  { %3017 = vmatpush3.msra.mxu1 %v3233_v9 }
0x1443   :  { %3018 = vmatprep.subr.mxu1 %v3187_v3 }
0x1444   :  { %3019 = vmatpush3.msra.mxu1 %v3241_v11 }
0x1445   :  { %3034 = vmatprep.subr.mxu1 %v3187_v3 }
0x14fd   :  { %v2112_v18 = vpop.f32.mrf.mxu1 }
0x14fe   :  { %v2113_v46 = vadd.f32 %v2112_v18, %v3236_v10 }
0x14ff   :  { %v3000_v30 = vpop.f32.mrf.mxu1 }
0x1500   :  { %3115 = vtanh.f32 %v2113_v46 }
0x150d   :  { %v3116_v32 = vpop.eup %3115 }
0x150e   :  { %v2117_v33 = vmul.f32 %v3116_v32, %v2042_v31 }
0x1510   :  { %v2118_v34 = vadd.f32 %v3114_v29, %v2117_v33 }
0x1512   :  { %3010 = vmatmul.mubr.msk.f32.vlgmr.msra.gmra.mxu0 %vm168_vm2, %v2118_v34 }
0x1513   :  { %3024 = vmatpush3.msra.mxu0 %v3222_v4  ;;  %3031 = vmatprep.mubr.msk.f32.mxu0 %vm3188_vm1, %v3187_v3 }
0x1514   :  { %3025 = vmatprep.subr.mxu0 %v3187_v3 }
0x1515   :  { %3026 = vmatpush3.msra.mxu0 %v3227_v7 }
0x1516   :  { %3027 = vmatprep.subr.mxu0 %v3187_v3 }
0x1517   :  { %3028 = vmatpush3.msra.mxu0 %v3233_v9 }
0x1518   :  { %3029 = vmatprep.subr.mxu0 %v3187_v3 }
0x1519   :  { %3030 = vmatpush3.msra.mxu0 %v3241_v11 }
0x151a   :  { %3045 = vmatprep.subr.mxu0 %v3187_v3 }
0x15d2   :  { %v2188_v35 = vpop.f32.mrf.mxu0 }
0x15d3   :  { %v2189_v4 = vadd.f32 %v2188_v35, %v3236_v10 }
0x15d4   :  { %v3011_v40 = vpop.f32.mrf.mxu0 }
0x15d5   :  { %3117 = vtanh.f32 %v2189_v4 }
0x15e2   :  { %v3118_v41 = vpop.eup %3117 }
0x15e3   :  { %v2193_v42 = vmul.f32 %v3118_v41, %v2042_v31 }
0x15e5   :  { %v2194_v43 = vadd.f32 %v2193_v42, %v2118_v34 }
0x15e7   :  { %3021 = vmatmul.mubr.msk.f32.vlgmr.msra.gmra.mxu1 %vm168_vm2, %v2194_v43 }
0x15e8   :  { %3035 = vmatpush3.msra.mxu1 %v3304_v36  ;;  %3042 = vmatprep.mubr.msk.f32.mxu1 %vm3188_vm1, %v3187_v3 }
0x15e9   :  { %3036 = vmatprep.subr.mxu1 %v3187_v3 }
0x15ea   :  { %3037 = vmatpush3.msra.mxu1 %v3306_v37 }
0x15eb   :  { %3038 = vmatprep.subr.mxu1 %v3187_v3 }
0x15ec   :  { %3039 = vmatpush3.msra.mxu1 %v3310_v38 }
0x15ed   :  { %3040 = vmatprep.subr.mxu1 %v3187_v3 }
0x15ee   :  { %3041 = vmatpush3.msra.mxu1 %v3314_v39 }
0x16a7   :  { %v2264_v7 = vpop.f32.mrf.mxu1 }
0x16a8   :  { %v2265_v9 = vadd.f32 %v2264_v7, %v3236_v10 }
0x16a9   :  { %v3022_v11 = vpop.f32.mrf.mxu1 }
0x16aa   :  { %3119 = vtanh.f32 %v2265_v9 }
0x16b7   :  { %v3120_v36 = vpop.eup %3119 }
0x16b8   :  { %v2269_v44 = vmul.f32 %v3120_v36, %v2042_v31 }
0x16ba   :  { %v2270_v45 = vadd.f32 %v2269_v44, %v2194_v43 }
0x16bc   :  { %3032 = vmatmul.mubr.msk.f32.vlgmr.msra.gmra.mxu0 %vm168_vm2, %v2270_v45 }
0x16bd   :  { %3053 = vmatprep.mubr.msk.f32.mxu0 %vm3188_vm1, %v3187_v3  ;;  %3046 = vmatpush3.msra.mxu0 %v57_v50 }
0x16be   :  { %3047 = vmatprep.subr.mxu0 %v3187_v3 }
0x16bf   :  { %3048 = vmatpush3.msra.mxu0 %v56_v51 }
0x16c0   :  { %3049 = vmatprep.subr.mxu0 %v3187_v3 }
0x16c1   :  { %3050 = vmatpush3.msra.mxu0 %v55_v52 }
0x16c2   :  { %3051 = vmatprep.subr.mxu0 %v3187_v3 }
0x177c   :  { %v2340_v37 = vpop.f32.mrf.mxu0 }
0x177d   :  { %v2341_v38 = vadd.f32 %v2340_v37, %v3236_v10  ;;  %v54_v10 = vld [vmem:[#allocation6 + $0x50] sm:$0xff] }
0x177e   :  { %v3033_v47 = vpop.f32.mrf.mxu0  ;;  %3052 = vmatpush3.msra.mxu0 %v54_v10 }
0x177f   :  { %3121 = vtanh.f32 %v2341_v38 }
0x178c   :  { %v3122_v48 = vpop.eup %3121 }
0x178d   :  { %v2345_v39 = vmul.f32 %v3122_v48, %v2042_v31 }
0x178f   :  { %v2346_v49 = vadd.f32 %v2345_v39, %v2270_v45 }
0x1791   :  { %3043 = vmatmul.mubr.msk.f32.vlgmr.msra.gmra.mxu1 %vm168_vm2, %v2346_v49 }
0x1851   :  { %v2416_v53 = vpop.f32.mrf.mxu1 }
0x1852   :  { %v2421_v54 = vrot.slane %v2416_v53, 4 }
0x1853   :  { %v3044_v55 = vpop.f32.mrf.mxu1 }
0x1854   :  { %v2423_v56 = vadd.f32 %v2421_v54, %v3584_v24 }
0x1856   :  { %3123 = vtanh.f32 %v2423_v56 }
0x1863   :  { %v3124_v57 = vpop.eup %3123 }
0x1864   :  { %v2430_v58 = vrot.slane %v3124_v57, 4 }
0x1866   :  { %3054 = vmatmul.mubr.msk.f32.vlgmr.msra.gmra.mxu0 %vm168_vm2, %v2430_v58 }
0x1926   :  { %v2499_v60 = vpop.f32.mrf.mxu0 }
0x1927   :  { %v2500_v61 = vadd.f32 %v2559_v59, %v2499_v60 }
0x1928   :  { %v3055_v3 = vpop.f32.mrf.mxu0 }
0x1929   :  { %2504 = vst.msk [vmem:[#allocation7] sm:$0xf] %vm2503_vm3, %v2500_v61 }
0x192a   :  { %3168 = shalt.err (!%p3165_p0)
}
0x192b   :  { %2514 = dma.vmem_to_hbm [thread:$0]  %s2512_s13, 64, %s3638_s3, [#allocation4]  }
0x192c   :  { %3181 = dma.done.wait [#allocation4], 64  }
0x192d   :  { %3182 = vsyncadd [#allocation4], 4294967232 }
0x192e   :  { %2518 = vsyncpa [#allocation3], 1 }
0x192f   :  { %2519 = vsyncpa [#allocation4], 1 }
0x1930   :  { %2520 = vsyncpa [#allocation5], 1 }

</bundles_post_ra>
